<compile_context>
chip_gen: v7x
topology: tpu7x:2x2x1
jax: 0.10.0
libtpu: 0.0.40
codegen_flags: <defaults>
</compile_context>

<pallas_src>
import functools

import jax
import jax.numpy as jnp
import numpy as np
from jax.experimental import pallas as pl
from jax.experimental.pallas import tpu as pltpu


def _conv2d_kernel(x_ref, w_ref, b_ref, o_ref, xp_ref, lhs_ref, *,
                   B, Cin, H, W, KH, pad, Ho, Wo, Cout):
    """One grid step = B batch elements.

    x_ref  : (B, Cin, H, W)        NCHW input block (f32)
    w_ref  : (KH*Cin*W, Cout*Wo)   banded bf16 weights (KW taps + width
                                   zero-padding folded into the band)
    b_ref  : (1, Cout*Wo)          bias tiled over Wo (f32)
    o_ref  : (B, Cout, Ho, Wo)     NCHW output block
    xp_ref : (H+2*pad, Cin*W)      scratch: height-padded, lane-packed plane
                                   xp[pad+h, c*W+w] = x[b, c, h, w]
    lhs_ref: (B*Ho, KH*Cin*W)      scratch: fused-K matmul LHS
    """
    WC = Cin * W

    # Height halo: zero ONLY the 2*pad halo rows (nothing below ever writes
    # them).  Unconditional on purpose -- must not be gated on program_id
    # while dimension_semantics=("parallel",) (second v7x core skips step 0).
    if pad > 0:
        xp_ref[0:pad, :] = jnp.zeros((pad, WC), xp_ref.dtype)
        xp_ref[pad + H:pad + H + pad, :] = jnp.zeros((pad, WC), xp_ref.dtype)

    # Build the fused-K LHS for all B elements (B, Cin, KH are small static
    # ints -> fully unrolled):  lhs[b*Ho + r, kh*WC + c*W + w] = xpad[c, r+kh, w]
    for b in range(B):
        # NCHW -> lane-packed padded plane (in-kernel relayout; replaces the
        # wrapper transpose and its extra HBM round trip).
        for c in range(Cin):
            xp_ref[pad:pad + H, c * W:(c + 1) * W] = x_ref[b, c, :, :]
        # KH row-shifted copies -> one deep-K LHS band per batch element.
        for kh in range(KH):
            lhs_ref[b * Ho:(b + 1) * Ho, kh * WC:(kh + 1) * WC] = (
                xp_ref[kh:kh + Ho, :])

    # ONE MXU matmul per grid step: bf16 operands (single pass), f32 acc.
    acc = jnp.dot(lhs_ref[...].astype(jnp.bfloat16), w_ref[...],
                  preferred_element_type=jnp.float32)
    acc = acc + b_ref[...]                       # bias broadcast over rows
    acc = acc.astype(o_ref.dtype)

    # Scatter the result columns (lane index co*Wo + wo) back into the NCHW
    # output block.  These are small masked VMEM stores; the block's HBM
    # writeback is a single contiguous DMA (it is the natural NCHW slab).
    for b in range(B):
        for co in range(Cout):
            o_ref[b, co, :, :] = acc[b * Ho:(b + 1) * Ho,
                                     co * Wo:(co + 1) * Wo]


def norm_conv2d(x_nchw, weight, bias, *, stride=1, padding=1, dilation=1,
                groups=1):
    """Forward of NormConv2d(norm='none'): Conv2d + Identity.

    x_nchw : (N, Cin, H, W)       PyTorch NCHW
    weight : (Cout, Cin, KH, KW)  PyTorch OIHW
    bias   : (Cout,)
    returns: (N, Cout, Ho, Wo)    NCHW, matching PyTorch
    """
    assert stride == 1 and dilation == 1 and groups == 1, (
        "this kernel implements the module's default Conv2d config")
    N, Cin, H, W = x_nchw.shape
    Cout, Cin_w, KH, KW = weight.shape
    assert Cin == Cin_w
    Ho = H + 2 * padding - KH + 1
    Wo = W + 2 * padding - KW + 1

    # 2-wide "parallel" grid so both v7x TensorCores get work; each core does
    # its whole batch share in one step (amortises per-step overhead).
    # TODO(synk): for very large N, cap B_blk (e.g. at 64) and add a trailing
    # "arbitrary" grid axis so the per-step blocks keep fitting in VMEM.
    num_par = 2 if (N % 2 == 0 and N >= 2) else 1
    B_blk = N // num_par

    # ---- one-time weight prep (parameters, not activations):
    # banded bf16 weight  w_bd[kh*Cin*W + c*W + wi, co*Wo + wo]
    #   = weight[co, c, kh, wi - wo + padding]   (zero outside the KW band),
    # which folds the KW taps AND the width zero-padding into one deep-K dot.
    wi = jnp.arange(W)[:, None]
    wo = jnp.arange(Wo)[None, :]
    shift = jnp.stack([(wi == wo + (kw - padding)).astype(weight.dtype)
                       for kw in range(KW)])                  # (KW, W, Wo)
    w_bd = jnp.einsum('kxy,ocjk->jcxoy', shift, weight)       # (KH,Cin,W,Cout,Wo)
    w_bd = w_bd.reshape(KH * Cin * W, Cout * Wo).astype(jnp.bfloat16)
    b_pk = jnp.repeat(bias, Wo).reshape(1, Cout * Wo).astype(jnp.float32)

    kernel = functools.partial(
        _conv2d_kernel, B=B_blk, Cin=Cin, H=H, W=W, KH=KH, pad=padding,
        Ho=Ho, Wo=Wo, Cout=Cout)

    return pl.pallas_call(
        kernel,
        out_shape=jax.ShapeDtypeStruct((N, Cout, Ho, Wo), x_nchw.dtype),
        grid_spec=pltpu.PrefetchScalarGridSpec(
            num_scalar_prefetch=0,
            grid=(num_par,),
            in_specs=[
                pl.BlockSpec((B_blk, Cin, H, W), lambda p: (p, 0, 0, 0)),
                # constant index_maps: weight/bias stay VMEM-resident, no
                # re-DMA per step.  (If W/Cout grow so w_bd reaches MiBs,
                # single-buffer it and tile the Wo axis.)
                pl.BlockSpec((KH * Cin * W, Cout * Wo), lambda p: (0, 0)),
                pl.BlockSpec((1, Cout * Wo), lambda p: (0, 0)),
            ],
            out_specs=pl.BlockSpec((B_blk, Cout, Ho, Wo),
                                   lambda p: (p, 0, 0, 0)),
            scratch_shapes=[
                pltpu.VMEM((H + 2 * padding, Cin * W), jnp.float32),
                pltpu.VMEM((B_blk * Ho, KH * Cin * W), jnp.float32),
            ],
        ),
        compiler_params=pltpu.CompilerParams(
            dimension_semantics=("parallel",),
            vmem_limit_bytes=32 * 1024 * 1024,
        ),
    )(x_nchw, w_bd, b_pk)


if __name__ == "__main__":
    # Small shapes consistent with the module.
    N, Cin, H, W = 2, 4, 16, 16
    Cout, KH, KW = 8, 3, 3
    padding = 1

    key = jax.random.PRNGKey(0)
    k_x, k_w, k_b = jax.random.split(key, 3)

    x = jax.random.normal(k_x, (N, Cin, H, W), dtype=jnp.float32)

    # Deterministic Conv2d-style init (kaiming-uniform bound = 1/sqrt(fan_in)).
    fan_in = Cin * KH * KW
    bound = 1.0 / np.sqrt(fan_in)
    weight = jax.random.uniform(k_w, (Cout, Cin, KH, KW), jnp.float32,
                                -bound, bound)
    bias = jax.random.uniform(k_b, (Cout,), jnp.float32, -bound, bound)

    conv = jax.jit(functools.partial(norm_conv2d, padding=padding))
    out = jax.block_until_ready(conv(x, weight, bias))

    # Reference with the same bf16-quantised operands (the kernel feeds bf16
    # to the MXU with f32 accumulation), exact-precision conv on top.
    x_q = x.astype(jnp.bfloat16).astype(jnp.float32)
    w_q = weight.astype(jnp.bfloat16).astype(jnp.float32)
    ref = jax.lax.conv_general_dilated(
        x_q, w_q,
        window_strides=(1, 1),
        padding=((padding, padding), (padding, padding)),
        dimension_numbers=("NCHW", "OIHW", "NCHW"),
        precision=jax.lax.Precision.HIGHEST,
    ) + bias.reshape(1, Cout, 1, 1)
    ref = jax.block_until_ready(ref)

    assert out.shape == (N, Cout, H, W)
    np.testing.assert_allclose(np.asarray(out), np.asarray(ref),
                               rtol=2e-5, atol=2e-5)

    print("KERNEL_OK")
</pallas_src>

<mosaic_0001>
module attributes {stable_mosaic.version = 11 : i64} {
  func.func @_conv2d_kernel(%arg0: i32, %arg1: memref<1x4x16x16xf32, #tpu.memory_space<vmem>>, %arg2: memref<192x128xbf16, #tpu.memory_space<vmem>>, %arg3: memref<1x128xf32, #tpu.memory_space<vmem>>, %arg4: memref<1x8x16x16xf32, #tpu.memory_space<vmem>>, %arg5: memref<18x64xf32, #tpu.memory_space<vmem>>, %arg6: memref<16x192xf32, #tpu.memory_space<vmem>>) attributes {dimension_semantics = [#tpu.dimension_semantics<parallel>], iteration_bounds = array<i64: 2>, scalar_prefetch = 0 : i64, scratch_operands = 2 : i64, tpu.core_type = #tpu.core_type<tc>, window_params = [{transform_indices = @transform_0, window_bounds = array<i64: 1, 4, 16, 16>}, {pipeline_mode = #tpu.pipeline_mode<synchronous>, transform_indices = @transform_1, window_bounds = array<i64: 192, 128>}, {pipeline_mode = #tpu.pipeline_mode<synchronous>, transform_indices = @transform_2, window_bounds = array<i64: 1, 128>}, {transform_indices = @transform_3, window_bounds = array<i64: 1, 8, 16, 16>}]} {
    %cst = arith.constant 0.000000e+00 : f32
    %0 = vector.broadcast %cst : f32 to vector<1x64xf32>
    %c0 = arith.constant 0 : index
    %c0_0 = arith.constant 0 : index
    %1 = vector.load %arg5[%c0, %c0_0] : memref<18x64xf32, #tpu.memory_space<vmem>>, vector<1x64xf32>
    tpu.vector_store %arg5[%c0, %c0_0], %0 {strides = array<i32>} : memref<18x64xf32, #tpu.memory_space<vmem>>, vector<1x64xf32>,
    %cst_1 = arith.constant 0.000000e+00 : f32
    %2 = vector.broadcast %cst_1 : f32 to vector<1x64xf32>
    %c17 = arith.constant 17 : index
    %c0_2 = arith.constant 0 : index
    %3 = vector.load %arg5[%c17, %c0_2] : memref<18x64xf32, #tpu.memory_space<vmem>>, vector<1x64xf32>
    tpu.vector_store %arg5[%c17, %c0_2], %2 {strides = array<i32>} : memref<18x64xf32, #tpu.memory_space<vmem>>, vector<1x64xf32>,
    %c0_3 = arith.constant 0 : index
    %c0_4 = arith.constant 0 : index
    %c0_5 = arith.constant 0 : index
    %c0_6 = arith.constant 0 : index
    %4 = vector.load %arg1[%c0_3, %c0_4, %c0_5, %c0_6] : memref<1x4x16x16xf32, #tpu.memory_space<vmem>>, vector<1x1x16x16xf32>
    %5 = vector.shape_cast %4 : vector<1x1x16x16xf32> to vector<16x16xf32>
    %c1 = arith.constant 1 : index
    %c0_7 = arith.constant 0 : index
    %6 = vector.load %arg5[%c1, %c0_7] : memref<18x64xf32, #tpu.memory_space<vmem>>, vector<16x16xf32>
    tpu.vector_store %arg5[%c1, %c0_7], %5 {strides = array<i32>} : memref<18x64xf32, #tpu.memory_space<vmem>>, vector<16x16xf32>,
    %c0_8 = arith.constant 0 : index
    %c1_9 = arith.constant 1 : index
    %c0_10 = arith.constant 0 : index
    %c0_11 = arith.constant 0 : index
    %7 = vector.load %arg1[%c0_8, %c1_9, %c0_10, %c0_11] : memref<1x4x16x16xf32, #tpu.memory_space<vmem>>, vector<1x1x16x16xf32>
    %8 = vector.shape_cast %7 : vector<1x1x16x16xf32> to vector<16x16xf32>
    %c1_12 = arith.constant 1 : index
    %c16 = arith.constant 16 : index
    %9 = vector.load %arg5[%c1_12, %c16] : memref<18x64xf32, #tpu.memory_space<vmem>>, vector<16x16xf32>
    tpu.vector_store %arg5[%c1_12, %c16], %8 {strides = array<i32>} : memref<18x64xf32, #tpu.memory_space<vmem>>, vector<16x16xf32>,
    %c0_13 = arith.constant 0 : index
    %c2 = arith.constant 2 : index
    %c0_14 = arith.constant 0 : index
    %c0_15 = arith.constant 0 : index
    %10 = vector.load %arg1[%c0_13, %c2, %c0_14, %c0_15] : memref<1x4x16x16xf32, #tpu.memory_space<vmem>>, vector<1x1x16x16xf32>
    %11 = vector.shape_cast %10 : vector<1x1x16x16xf32> to vector<16x16xf32>
    %c1_16 = arith.constant 1 : index
    %c32 = arith.constant 32 : index
    %12 = vector.load %arg5[%c1_16, %c32] : memref<18x64xf32, #tpu.memory_space<vmem>>, vector<16x16xf32>
    tpu.vector_store %arg5[%c1_16, %c32], %11 {strides = array<i32>} : memref<18x64xf32, #tpu.memory_space<vmem>>, vector<16x16xf32>,
    %c0_17 = arith.constant 0 : index
    %c3 = arith.constant 3 : index
    %c0_18 = arith.constant 0 : index
    %c0_19 = arith.constant 0 : index
    %13 = vector.load %arg1[%c0_17, %c3, %c0_18, %c0_19] : memref<1x4x16x16xf32, #tpu.memory_space<vmem>>, vector<1x1x16x16xf32>
    %14 = vector.shape_cast %13 : vector<1x1x16x16xf32> to vector<16x16xf32>
    %c1_20 = arith.constant 1 : index
    %c48 = arith.constant 48 : index
    %15 = vector.load %arg5[%c1_20, %c48] : memref<18x64xf32, #tpu.memory_space<vmem>>, vector<16x16xf32>
    tpu.vector_store %arg5[%c1_20, %c48], %14 {strides = array<i32>} : memref<18x64xf32, #tpu.memory_space<vmem>>, vector<16x16xf32>,
    %c0_21 = arith.constant 0 : index
    %c0_22 = arith.constant 0 : index
    %16 = vector.load %arg5[%c0_21, %c0_22] : memref<18x64xf32, #tpu.memory_space<vmem>>, vector<16x64xf32>
    %c0_23 = arith.constant 0 : index
    %c0_24 = arith.constant 0 : index
    %17 = vector.load %arg6[%c0_23, %c0_24] : memref<16x192xf32, #tpu.memory_space<vmem>>, vector<16x64xf32>
    tpu.vector_store %arg6[%c0_23, %c0_24], %16 {strides = array<i32>} : memref<16x192xf32, #tpu.memory_space<vmem>>, vector<16x64xf32>,
    %c1_25 = arith.constant 1 : index
    %c0_26 = arith.constant 0 : index
    %18 = vector.load %arg5[%c1_25, %c0_26] : memref<18x64xf32, #tpu.memory_space<vmem>>, vector<16x64xf32>
    %c0_27 = arith.constant 0 : index
    %c64 = arith.constant 64 : index
    %19 = vector.load %arg6[%c0_27, %c64] : memref<16x192xf32, #tpu.memory_space<vmem>>, vector<16x64xf32>
    tpu.vector_store %arg6[%c0_27, %c64], %18 {strides = array<i32>} : memref<16x192xf32, #tpu.memory_space<vmem>>, vector<16x64xf32>,
    %c2_28 = arith.constant 2 : index
    %c0_29 = arith.constant 0 : index
    %20 = vector.load %arg5[%c2_28, %c0_29] : memref<18x64xf32, #tpu.memory_space<vmem>>, vector<16x64xf32>
    %c0_30 = arith.constant 0 : index
    %c128 = arith.constant 128 : index
    %21 = vector.load %arg6[%c0_30, %c128] : memref<16x192xf32, #tpu.memory_space<vmem>>, vector<16x64xf32>
    tpu.vector_store %arg6[%c0_30, %c128], %20 {strides = array<i32>} : memref<16x192xf32, #tpu.memory_space<vmem>>, vector<16x64xf32>,
    %c0_31 = arith.constant 0 : index
    %c0_32 = arith.constant 0 : index
    %22 = vector.load %arg6[%c0_31, %c0_32] : memref<16x192xf32, #tpu.memory_space<vmem>>, vector<16x192xf32>
    %23 = arith.truncf %22 : vector<16x192xf32> to vector<16x192xbf16>
    %c0_33 = arith.constant 0 : index
    %c0_34 = arith.constant 0 : index
    %24 = vector.load %arg2[%c0_33, %c0_34] : memref<192x128xbf16, #tpu.memory_space<vmem>>, vector<192x128xbf16>
    %cst_35 = arith.constant dense<0.000000e+00> : vector<16x128xf32>
    %25 = tpu.matmul %23, %24, %cst_35 {dimension_numbers = #tpu.dot_dimension_numbers<[1], [0], [0], [1], [0, 0, 1, 1], [], []>} : vector<16x192xbf16>, vector<192x128xbf16>, vector<16x128xf32> -> vector<16x128xf32>
    %c0_36 = arith.constant 0 : index
    %c0_37 = arith.constant 0 : index
    %26 = vector.load %arg3[%c0_36, %c0_37] : memref<1x128xf32, #tpu.memory_space<vmem>>, vector<1x128xf32>
    %27 = vector.broadcast %26 : vector<1x128xf32> to vector<16x128xf32>
    %28 = arith.addf %25, %27 : vector<16x128xf32>
    %29 = vector.extract_strided_slice %28 {offsets = [0, 0], sizes = [16, 16], strides = [1, 1]} : vector<16x128xf32> to vector<16x16xf32>
    %c0_38 = arith.constant 0 : index
    %c0_39 = arith.constant 0 : index
    %c0_40 = arith.constant 0 : index
    %c0_41 = arith.constant 0 : index
    %30 = vector.load %arg4[%c0_38, %c0_39, %c0_40, %c0_41] : memref<1x8x16x16xf32, #tpu.memory_space<vmem>>, vector<1x1x16x16xf32>
    %31 = vector.shape_cast %30 : vector<1x1x16x16xf32> to vector<16x16xf32>
    %32 = vector.shape_cast %29 : vector<16x16xf32> to vector<1x1x16x16xf32>
    tpu.vector_store %arg4[%c0_38, %c0_39, %c0_40, %c0_41], %32 {strides = array<i32>} : memref<1x8x16x16xf32, #tpu.memory_space<vmem>>, vector<1x1x16x16xf32>,
    %33 = vector.extract_strided_slice %28 {offsets = [0, 16], sizes = [16, 16], strides = [1, 1]} : vector<16x128xf32> to vector<16x16xf32>
    %c0_42 = arith.constant 0 : index
    %c1_43 = arith.constant 1 : index
    %c0_44 = arith.constant 0 : index
    %c0_45 = arith.constant 0 : index
    %34 = vector.load %arg4[%c0_42, %c1_43, %c0_44, %c0_45] : memref<1x8x16x16xf32, #tpu.memory_space<vmem>>, vector<1x1x16x16xf32>
    %35 = vector.shape_cast %34 : vector<1x1x16x16xf32> to vector<16x16xf32>
    %36 = vector.shape_cast %33 : vector<16x16xf32> to vector<1x1x16x16xf32>
    tpu.vector_store %arg4[%c0_42, %c1_43, %c0_44, %c0_45], %36 {strides = array<i32>} : memref<1x8x16x16xf32, #tpu.memory_space<vmem>>, vector<1x1x16x16xf32>,
    %37 = vector.extract_strided_slice %28 {offsets = [0, 32], sizes = [16, 16], strides = [1, 1]} : vector<16x128xf32> to vector<16x16xf32>
    %c0_46 = arith.constant 0 : index
    %c2_47 = arith.constant 2 : index
    %c0_48 = arith.constant 0 : index
    %c0_49 = arith.constant 0 : index
    %38 = vector.load %arg4[%c0_46, %c2_47, %c0_48, %c0_49] : memref<1x8x16x16xf32, #tpu.memory_space<vmem>>, vector<1x1x16x16xf32>
    %39 = vector.shape_cast %38 : vector<1x1x16x16xf32> to vector<16x16xf32>
    %40 = vector.shape_cast %37 : vector<16x16xf32> to vector<1x1x16x16xf32>
    tpu.vector_store %arg4[%c0_46, %c2_47, %c0_48, %c0_49], %40 {strides = array<i32>} : memref<1x8x16x16xf32, #tpu.memory_space<vmem>>, vector<1x1x16x16xf32>,
    %41 = vector.extract_strided_slice %28 {offsets = [0, 48], sizes = [16, 16], strides = [1, 1]} : vector<16x128xf32> to vector<16x16xf32>
    %c0_50 = arith.constant 0 : index
    %c3_51 = arith.constant 3 : index
    %c0_52 = arith.constant 0 : index
    %c0_53 = arith.constant 0 : index
    %42 = vector.load %arg4[%c0_50, %c3_51, %c0_52, %c0_53] : memref<1x8x16x16xf32, #tpu.memory_space<vmem>>, vector<1x1x16x16xf32>
    %43 = vector.shape_cast %42 : vector<1x1x16x16xf32> to vector<16x16xf32>
    %44 = vector.shape_cast %41 : vector<16x16xf32> to vector<1x1x16x16xf32>
    tpu.vector_store %arg4[%c0_50, %c3_51, %c0_52, %c0_53], %44 {strides = array<i32>} : memref<1x8x16x16xf32, #tpu.memory_space<vmem>>, vector<1x1x16x16xf32>,
    %45 = vector.extract_strided_slice %28 {offsets = [0, 64], sizes = [16, 16], strides = [1, 1]} : vector<16x128xf32> to vector<16x16xf32>
    %c0_54 = arith.constant 0 : index
    %c4 = arith.constant 4 : index
    %c0_55 = arith.constant 0 : index
    %c0_56 = arith.constant 0 : index
    %46 = vector.load %arg4[%c0_54, %c4, %c0_55, %c0_56] : memref<1x8x16x16xf32, #tpu.memory_space<vmem>>, vector<1x1x16x16xf32>
    %47 = vector.shape_cast %46 : vector<1x1x16x16xf32> to vector<16x16xf32>
    %48 = vector.shape_cast %45 : vector<16x16xf32> to vector<1x1x16x16xf32>
    tpu.vector_store %arg4[%c0_54, %c4, %c0_55, %c0_56], %48 {strides = array<i32>} : memref<1x8x16x16xf32, #tpu.memory_space<vmem>>, vector<1x1x16x16xf32>,
    %49 = vector.extract_strided_slice %28 {offsets = [0, 80], sizes = [16, 16], strides = [1, 1]} : vector<16x128xf32> to vector<16x16xf32>
    %c0_57 = arith.constant 0 : index
    %c5 = arith.constant 5 : index
    %c0_58 = arith.constant 0 : index
    %c0_59 = arith.constant 0 : index
    %50 = vector.load %arg4[%c0_57, %c5, %c0_58, %c0_59] : memref<1x8x16x16xf32, #tpu.memory_space<vmem>>, vector<1x1x16x16xf32>
    %51 = vector.shape_cast %50 : vector<1x1x16x16xf32> to vector<16x16xf32>
    %52 = vector.shape_cast %49 : vector<16x16xf32> to vector<1x1x16x16xf32>
    tpu.vector_store %arg4[%c0_57, %c5, %c0_58, %c0_59], %52 {strides = array<i32>} : memref<1x8x16x16xf32, #tpu.memory_space<vmem>>, vector<1x1x16x16xf32>,
    %53 = vector.extract_strided_slice %28 {offsets = [0, 96], sizes = [16, 16], strides = [1, 1]} : vector<16x128xf32> to vector<16x16xf32>
    %c0_60 = arith.constant 0 : index
    %c6 = arith.constant 6 : index
    %c0_61 = arith.constant 0 : index
    %c0_62 = arith.constant 0 : index
    %54 = vector.load %arg4[%c0_60, %c6, %c0_61, %c0_62] : memref<1x8x16x16xf32, #tpu.memory_space<vmem>>, vector<1x1x16x16xf32>
    %55 = vector.shape_cast %54 : vector<1x1x16x16xf32> to vector<16x16xf32>
    %56 = vector.shape_cast %53 : vector<16x16xf32> to vector<1x1x16x16xf32>
    tpu.vector_store %arg4[%c0_60, %c6, %c0_61, %c0_62], %56 {strides = array<i32>} : memref<1x8x16x16xf32, #tpu.memory_space<vmem>>, vector<1x1x16x16xf32>,
    %57 = vector.extract_strided_slice %28 {offsets = [0, 112], sizes = [16, 16], strides = [1, 1]} : vector<16x128xf32> to vector<16x16xf32>
    %c0_63 = arith.constant 0 : index
    %c7 = arith.constant 7 : index
    %c0_64 = arith.constant 0 : index
    %c0_65 = arith.constant 0 : index
    %58 = vector.load %arg4[%c0_63, %c7, %c0_64, %c0_65] : memref<1x8x16x16xf32, #tpu.memory_space<vmem>>, vector<1x1x16x16xf32>
    %59 = vector.shape_cast %58 : vector<1x1x16x16xf32> to vector<16x16xf32>
    %60 = vector.shape_cast %57 : vector<16x16xf32> to vector<1x1x16x16xf32>
    tpu.vector_store %arg4[%c0_63, %c7, %c0_64, %c0_65], %60 {strides = array<i32>} : memref<1x8x16x16xf32, #tpu.memory_space<vmem>>, vector<1x1x16x16xf32>,
    return
  }
  func.func @transform_0(%arg0: i32) -> (i32, i32, i32, i32) {
    %c0_i32 = arith.constant 0 : i32
    %c0_i32_0 = arith.constant 0 : i32
    %c0_i32_1 = arith.constant 0 : i32
    %c0_i32_2 = arith.constant 0 : i32
    return %arg0, %c0_i32, %c0_i32_0, %c0_i32_1 : i32, i32, i32, i32
  }
  func.func @transform_1(%arg0: i32) -> (i32, i32) {
    %c0_i32 = arith.constant 0 : i32
    %c0_i32_0 = arith.constant 0 : i32
    %c0_i32_1 = arith.constant 0 : i32
    return %c0_i32, %c0_i32_0 : i32, i32
  }
  func.func @transform_2(%arg0: i32) -> (i32, i32) {
    %c0_i32 = arith.constant 0 : i32
    %c0_i32_0 = arith.constant 0 : i32
    %c0_i32_1 = arith.constant 0 : i32
    return %c0_i32, %c0_i32_0 : i32, i32
  }
  func.func @transform_3(%arg0: i32) -> (i32, i32, i32, i32) {
    %c0_i32 = arith.constant 0 : i32
    %c0_i32_0 = arith.constant 0 : i32
    %c0_i32_1 = arith.constant 0 : i32
    %c0_i32_2 = arith.constant 0 : i32
    return %arg0, %c0_i32, %c0_i32_0, %c0_i32_1 : i32, i32, i32, i32
  }
}

</mosaic_0001>

<bundles_post_ra>
// kernel: norm_conv2d.1
= control target key start
LH: loop header
LB: loop body
LE: loop exit
PB: predicated region body
PF: predicated region fallthrough
CT: control target
= control target key end

     0   :  { %8 = vsyncpa [#allocation5], 0  ;;  %s948_s0 = inlined_call_operand.vmem [shape: f32[2,4,16,16], index: 0, kind: input, shape index: {}]   ;;  %s949_s1 = inlined_call_operand.vmem [shape: bf16[192,128], index: 1, kind: input, shape index: {}]   ;;  %s950_s2 = inlined_call_operand.vmem [shape: f32[1,128], index: 2, kind: input, shape index: {}]   ;;  %s951_s3 = inlined_call_operand.hbm [shape: f32[2,8,16,16], index: 3, kind: output, shape index: {}]  }
   0x1   :  { %10 = vsyncpa [#allocation5 + $0x1], 0  ;;  %s744_s12 = smov 0   ;;  %s746_s13 = smov 0  }
   0x2   :  { %s748_s14 = smov 0   ;;  %s750_s15 = smov 0  }
   0x3 LB: > { %s765_s16 = sadd.s32 4294967295, %s710_s15   ;;  %s538_s17 = sadd.s32 4294967294, %s710_s15   ;;  %s710_s15 = sphi %s750_s15, %s957_s15   ;;  %s706_s14 = sphi %s748_s14, %s956_s14   ;;  %s702_s13 = sphi %s746_s13, %s955_s13   ;;  %s698_s12 = sphi %s744_s12, %s954_s12  }
   0x4   : > { %s769_s18 = sadd.s32 1, %s710_s15   ;;  %s91_s19 = sadd.s32 1, %s706_s14 }
   0x5   : > { %s88_s20 = ssub.s32 %s710_s15, %s769_s18  ;;  %p101_p0 = scmp.ne.s32.totalorder %s706_s14, %s702_s13 }
   0x6   : > { %p89_p1 = scmp.eq.s32.totalorder %s88_s20, 0  ;;  %p102_p2 = scmp.eq.s32.totalorder %s765_s16, 1 }
   0x7   : > { %p107_p3 = scmp.ne.s32.totalorder %s702_s13, %s698_s12  ;;  %p108_p4 = scmp.eq.s32.totalorder %s538_s17, 1 }
   0x8   : > { %s780_s21 = scalar_select %p89_p1, %s706_s14, %s91_s19  }
   0x9   : > { %p782_p5 = por %p102_p2, %p101_p0  ;;  %p786_p6 = por %p108_p4, %p107_p3 }
   0xa   : > { %p541_p7 = scmp.ge.s32.totalorder %s710_s15, 1  ;;  %p140_p8 = scmp.lt.s32.totalorder %s710_s15, 3 }
   0xc   : > { %p141_p9 = pnand %p541_p7, %p140_p8 }
   0xd   : > { %p164_p10 = scmp.lt.s32.totalorder (!%p141_p9), %s765_s16, 1  ;;  %vm170_vm0 = vcmask (!%p141_p9), 516096   ;;  %v712_v0 = vmov (!%p141_p9), 0.0   ;;  %vm175_vm1 = vcmask (!%p141_p9), 130048   ;;  %s713_s29 = smov (!%p141_p9), 32   ;;  %v636_v9 = vld [vmem:[%s949_s1] sm:$0xff] (!%p141_p9)  }
   0xe   : > { %144 = sbr.rel (%p141_p9) target bundleno = 652 (0x28c), region = 32  ;;  %172 = vst.msk [vmem:[#allocation2 + $0x11] sm:$0x1] (!%p141_p9), %vm170_vm0, %v712_v0  ;;  %171 = vst.msk [vmem:[#allocation2] sm:$0x1] (!%p141_p9), %vm170_vm0, %v712_v0  ;;  %s714_s30 = smov (!%p141_p9), 16  }
   0xf   : > { %s715_s4 = smov (!%p141_p9), 48   ;;  %v716_v10 = vmov (!%p141_p9), 0   ;;  %v637_v11 = vld [vmem:[%s949_s1 + $0x8] sm:$0xff] (!%p141_p9)   ;;  %v638_v12 = vld [vmem:[%s949_s1 + $0x10] sm:$0xff] (!%p141_p9)   ;;  %v639_v13 = vld [vmem:[%s949_s1 + $0x18] sm:$0xff] (!%p141_p9)   ;;  %vm189_vm2 = vcmask (!%p141_p9), 261248  }
  0x10   : > { %354 = vmatprep.subr.bf16.mxu0 (!%p141_p9), %v716_v10  ;;  %v640_v14 = vld [vmem:[%s949_s1 + $0x20] sm:$0xff] (!%p141_p9)   ;;  %v641_v15 = vld [vmem:[%s949_s1 + $0x28] sm:$0xff] (!%p141_p9)   ;;  %v642_v16 = vld [vmem:[%s949_s1 + $0x30] sm:$0xff] (!%p141_p9)   ;;  %vm203_vm3 = vcmask (!%p141_p9), 392448   ;;  %vm217_vm4 = vcmask (!%p141_p9), 523648   ;;  %vm222_vm5 = vcmask (!%p141_p9), 523264  }
  0x11   : > { %355 = vmatpush1.bf16.msra.mxu0 (!%p141_p9), %v636_v9  ;;  %v643_v17 = vld [vmem:[%s949_s1 + $0x38] sm:$0xff] (!%p141_p9)   ;;  %v644_v18 = vld [vmem:[%s949_s1 + $0x40] sm:$0xff] (!%p141_p9)   ;;  %v645_v19 = vld [vmem:[%s949_s1 + $0x48] sm:$0xff] (!%p141_p9)   ;;  %s717_s20 = smov (!%p141_p9), 64   ;;  %vm235_vm6 = vcmask (!%p141_p9), 1048064   ;;  %s718_s5 = smov (!%p141_p9), 112  }
  0x12   : > { %356 = vmatprep.subr.bf16.mxu0 (!%p141_p9), %v716_v10  ;;  %v646_v24 = vld [vmem:[%s949_s1 + $0x50] sm:$0xff] (!%p141_p9)   ;;  %v647_v25 = vld [vmem:[%s949_s1 + $0x58] sm:$0xff] (!%p141_p9)   ;;  %v551_v42 = vld [vmem:[%s950_s2] ss:$0 sm:$0xff] (!%p141_p9)  ;;  %s719_s6 = smov (!%p141_p9), 96   ;;  %s720_s7 = smov (!%p141_p9), 80  }
  0x13   : > { %s721_s11 = smov (!%p141_p9), [#allocation4]  }
  0x14   : > { %s652_s17 = sshll.u32 (!%p141_p9), %s721_s11, 4  ;;  %s653_s17 = int_to_ptr.vmem [resolvable:$false] %s652_s17 }
  0x15   : > { %s165_s24 = scalar_select %p164_p10, %s765_s16, 1  ;;  %357 = vmatpush1.bf16.msra.mxu0 %v637_v11 }
  0x16   : > { %358 = vmatprep.subr.bf16.mxu0 %v716_v10  ;;  %s654_s19 = scalar_lea.vmem %s653_s17, 4096 }
  0x17   : > { %s584_s25 = sshll.u32 %s165_s24, 6  ;;  %s161_s24 = sand.u32 1, %s702_s13  }
  0x18   : > { %s168_s28 = scalar_lea.vmem %s948_s0, %s584_s25  ;;  %s542_s25 = sshll.u32 %s161_s24, 7 }
  0x19   : > { %v547_v1 = vld [vmem:[%s168_s28 + $0x20] sm:$0xff]  ;;  %v545_v2 = vld [vmem:[%s168_s28 + $0x10] sm:$0xff]  ;;  %v548_v3 = vld [vmem:[%s168_s28 + $0x28] sm:$0xff]  ;;  %359 = vmatpush1.bf16.msra.mxu0 %v638_v12 }
  0x1a   : > { %197 = vrot.lane.b32.xlu1 %v547_v1, %s713_s29  ;;  %183 = vrot.lane.b32.xlu0 %v545_v2, %s714_s30  ;;  %v546_v4 = vld [vmem:[%s168_s28 + $0x18] sm:$0xff]  ;;  %v173_v5 = vld [vmem:[%s168_s28] sm:$0xff] }
  0x1b   : > { %v174_v6 = vld [vmem:[%s168_s28 + $0x8] sm:$0xff]  ;;  %176 = vst.msk [vmem:[#allocation2 + $0x1] sm:$0xff] %vm175_vm1, %v173_v5  ;;  %v550_v7 = vld [vmem:[%s168_s28 + $0x38] sm:$0xff]  ;;  %v549_v8 = vld [vmem:[%s168_s28 + $0x30] sm:$0xff]  ;;  %360 = vmatprep.subr.bf16.mxu0 %v716_v10  ;;  %s854_s28 = scalar_lea.vmem [#allocation4], %s542_s25 }
  0x1c   : > { %177 = vst.msk [vmem:[#allocation2 + $0x9] sm:$0xff] %vm175_vm1, %v174_v6 }
  0x1d   : > { %361 = vmatpush1.bf16.msra.mxu0 %v639_v13 }
  0x1e   : > { %199 = vrot.lane.b32.xlu1 %v548_v3, %s713_s29  ;;  %185 = vrot.lane.b32.xlu0 %v546_v4, %s714_s30 }
  0x1f   : > { %362 = vmatprep.subr.bf16.mxu0 %v716_v10 }
  0x21   : > { %363 = vmatpush1.bf16.msra.mxu0 %v640_v14 }
  0x22   : > { %213 = vrot.lane.b32.xlu1 %v550_v7, %s715_s4  ;;  %211 = vrot.lane.b32.xlu0 %v549_v8, %s715_s4 }
  0x23   : > { %364 = vmatprep.subr.bf16.mxu0 %v716_v10 }
  0x25   : > { %365 = vmatpush1.bf16.msra.mxu0 %v641_v15 }
  0x26   : > { %366 = vmatprep.subr.bf16.mxu0 %v716_v10 }
  0x29   : > { %367 = vmatpush1.bf16.msra.mxu0 %v642_v16 }
  0x2a   : > { %368 = vmatprep.subr.bf16.mxu0 %v716_v10 }
  0x2d   : > { %369 = vmatpush1.bf16.msra.mxu0 %v643_v17 }
  0x2e   : > { %370 = vmatprep.subr.bf16.mxu0 %v716_v10 }
  0x31   : > { %371 = vmatpush1.bf16.msra.mxu0 %v644_v18 }
  0x32   : > { %372 = vmatprep.subr.bf16.mxu0 %v716_v10 }
  0x35   : > { %373 = vmatpush1.bf16.msra.mxu0 %v645_v19 }
  0x36   : > { %374 = vmatprep.subr.bf16.mxu0 %v716_v10 }
  0x39   : > { %375 = vmatpush1.bf16.msra.mxu0 %v646_v24 }
  0x3a   : > { %376 = vmatprep.subr.bf16.mxu0 %v716_v10 }
  0x3d   : > { %377 = vmatpush1.bf16.msra.mxu0 %v647_v25 }
  0x8c   : > { %v198_v20 = vpop.permute.xlu1 %197  ;;  %v184_v21 = vpop.permute.xlu0 %183 }
  0x8d   : > { %190 = vst.msk [vmem:[#allocation2 + $0x1] sm:$0xff] %vm189_vm2, %v184_v21 }
  0x8e   : > { %204 = vst.msk [vmem:[#allocation2 + $0x1] sm:$0xff] %vm203_vm3, %v198_v20 }
  0x90   : > { %v200_v22 = vpop.permute.xlu1 %199  ;;  %v186_v23 = vpop.permute.xlu0 %185 }
  0x91   : > { %191 = vst.msk [vmem:[#allocation2 + $0x9] sm:$0xff] %vm189_vm2, %v186_v23 }
  0x92   : > { %205 = vst.msk [vmem:[#allocation2 + $0x9] sm:$0xff] %vm203_vm3, %v200_v22 }
  0x94   : > { %v214_v26 = vpop.permute.xlu1 %213  ;;  %v212_v27 = vpop.permute.xlu0 %211 }
  0x95   : > { %219 = vst.msk [vmem:[#allocation2 + $0x9] sm:$0xff] %vm217_vm4, %v214_v26  ;;  %218 = vst.msk [vmem:[#allocation2 + $0x1] sm:$0xff] %vm217_vm4, %v212_v27 }
  0x9c   : > { %v226_v28 = vld [vmem:[#allocation2 + $0x9] sm:$0xff]  ;;  %v225_v29 = vld [vmem:[#allocation2 + $0x1] sm:$0xff] }
  0x9d   : > { %v238_v30 = vld [vmem:[#allocation2 + $0x2] sm:$0xff]  ;;  %231 = vrot.lane.b32.xlu1 %v226_v28, %s717_s20  ;;  %229 = vrot.lane.b32.xlu0 %v225_v29, %s717_s20  ;;  %v239_v31 = vld [vmem:[#allocation2 + $0xa] sm:$0xff] }
  0x9e   : > { %240 = vst.msk [vmem:[#allocation3 + $0x8] sm:$0xff] %vm222_vm5, %v238_v30  ;;  %v221_v32 = vld [vmem:[#allocation2 + $0x8] sm:$0xff]  ;;  %v220_v33 = vld [vmem:[#allocation2] sm:$0xff]  ;;  %241 = vst.msk [vmem:[#allocation3 + $0x18] sm:$0xff] %vm222_vm5, %v239_v31 }
  0x9f   : > { %224 = vst.msk [vmem:[#allocation3 + $0x10] sm:$0xff] %vm222_vm5, %v221_v32  ;;  %223 = vst.msk [vmem:[#allocation3] sm:$0xff] %vm222_vm5, %v220_v33 }
  0xa5   : > { %v243_v34 = vld [vmem:[#allocation3 + $0x8] sm:$0xff]  ;;  %v245_v35 = vld [vmem:[#allocation3 + $0x18] sm:$0xff] }
  0xa6   : > { %v247_v36 = vpack.c.bf16 %v245_v35, %v243_v34 }
  0xa8   : > { %564 = vmatprep.mubr.msk.bf16.mxu0 %vm222_vm5, %v247_v36 }
 0x10f   : > { %v232_v37 = vpop.permute.xlu1 %231  ;;  %v230_v38 = vpop.permute.xlu0 %229 }
 0x110   : > { %237 = vst.msk [vmem:[#allocation3 + $0x10] sm:$0xff] %vm235_vm6, %v232_v37  ;;  %236 = vst.msk [vmem:[#allocation3] sm:$0xff] %vm235_vm6, %v230_v38 }
 0x117   : > { %v242_v39 = vld [vmem:[#allocation3] sm:$0xff]  ;;  %v244_v40 = vld [vmem:[#allocation3 + $0x10] sm:$0xff] }
 0x118   : > { %v246_v41 = vpack.c.bf16 %v244_v40, %v242_v39 }
 0x11a   : > { %387 = vmatmul.mubr.bf16.vlgmr.msra.gmra.mrb[0].mxu0 %v246_v41 }
 0x1ed   : > { %v388_v43 = vpop.f32.mrb[0].mxu0 }
 0x1ee   : > { %v389_v44 = vadd.f32 %v551_v42, %v388_v43  ;;  %v390_v45 = vpop.f32.mrb[1].mxu0 }
 0x1ef   : > { %v391_v46 = vpop.f32.mrb[2].mxu0 }
 0x1f0   : > { %395 = vst.msk [vmem:[%s854_s28] sm:$0xff] %vm175_vm1, %v389_v44  ;;  %v392_v47 = vadd.f32 %v551_v42, %v391_v46  ;;  %v393_v48 = vpop.f32.mrb[3].mxu0  ;;  %399 = vrot.lane.b32.xlu0 %v389_v44, %s718_s5 }
 0x1f2   : > { %396 = vst.msk [vmem:[%s854_s28 + $0x8] sm:$0xff] %vm175_vm1, %v392_v47  ;;  %401 = vrot.lane.b32.xlu1 %v392_v47, %s718_s5 }
 0x1f4   : > { %408 = vrot.lane.b32.xlu0 %v389_v44, %s719_s6 }
 0x1f6   : > { %410 = vrot.lane.b32.xlu1 %v392_v47, %s719_s6 }
 0x1f8   : > { %417 = vrot.lane.b32.xlu0 %v389_v44, %s720_s7 }
 0x1fa   : > { %419 = vrot.lane.b32.xlu1 %v392_v47, %s720_s7 }
 0x1fc   : > { %426 = vrot.lane.b32.xlu0 %v389_v44, %s717_s20 }
 0x1fe   : > { %428 = vrot.lane.b32.xlu1 %v392_v47, %s717_s20 }
 0x200   : > { %435 = vrot.lane.b32.xlu0 %v389_v44, %s715_s4 }
 0x202   : > { %437 = vrot.lane.b32.xlu1 %v392_v47, %s715_s4 }
 0x204   : > { %444 = vrot.lane.b32.xlu0 %v389_v44, %s713_s29 }
 0x206   : > { %446 = vrot.lane.b32.xlu1 %v392_v47, %s713_s29  ;;  %s585_s29 = sshll.u32 %s765_s16, 11  ;;  %s907_s16 = scalar_lea.sflag [#allocation5], %s161_s24 }
 0x207   : > { %s897_s9 = scalar_lea.hbm %s951_s3, %s585_s29 }
 0x208   : > { %453 = vrot.lane.b32.xlu0 %v389_v44, %s714_s30 }
 0x20a   : > { %455 = vrot.lane.b32.xlu1 %v392_v47, %s714_s30  ;;  %s476_s30 = sshll.u32 %s854_s28, 4  ;;  %s899_s30 = int_to_ptr.vmem [resolvable:$true] %s476_s30 }
 0x20b   : > { %s648_s10 = scalar_lea.vmem %s899_s30, 2048  ;;  %p655_p0 = scmp.lt.s32.totalorder %s899_s30, %s653_s17 }
 0x20c   : > { %p649_p11 = scmp.ne.s32.totalorder %s899_s30, %s648_s10  ;;  %p656_p1 = scmp.lt.s32.totalorder %s654_s19, %s648_s10 }
 0x20e   : > { %p650_p12 = pnand %p649_p11, %p782_p5  ;;  %p657_p2 = por %p656_p1, %p655_p0 }
 0x210   : > { %p651_p13 = pneg %p650_p12 }
 0x212   : > { %p658_p3 = pnand %p657_p2, %p651_p13 }
 0x262   : > { %v400_v49 = vpop.permute.xlu0 %399 }
 0x263   : > { %565 = vst.msk [vmem:[%s854_s28 + $0x10] sm:$0xff] %vm175_vm1, %v400_v49 }
 0x264   : > { %v402_v50 = vpop.permute.xlu1 %401 }
 0x265   : > { %566 = vst.msk [vmem:[%s854_s28 + $0x18] sm:$0xff] %vm175_vm1, %v402_v50 }
 0x266   : > { %v409_v51 = vpop.permute.xlu0 %408 }
 0x267   : > { %567 = vst.msk [vmem:[%s854_s28 + $0x20] sm:$0xff] %vm175_vm1, %v409_v51 }
 0x268   : > { %v411_v52 = vpop.permute.xlu1 %410 }
 0x269   : > { %568 = vst.msk [vmem:[%s854_s28 + $0x28] sm:$0xff] %vm175_vm1, %v411_v52 }
 0x26a   : > { %v418_v53 = vpop.permute.xlu0 %417 }
 0x26b   : > { %569 = vst.msk [vmem:[%s854_s28 + $0x30] sm:$0xff] %vm175_vm1, %v418_v53 }
 0x26c   : > { %v420_v54 = vpop.permute.xlu1 %419 }
 0x26d   : > { %570 = vst.msk [vmem:[%s854_s28 + $0x38] sm:$0xff] %vm175_vm1, %v420_v54 }
 0x26e   : > { %v427_v55 = vpop.permute.xlu0 %426 }
 0x26f   : > { %571 = vst.msk [vmem:[%s854_s28 + $0x40] sm:$0xff] %vm175_vm1, %v427_v55 }
 0x270   : > { %v429_v56 = vpop.permute.xlu1 %428 }
 0x271   : > { %572 = vst.msk [vmem:[%s854_s28 + $0x48] sm:$0xff] %vm175_vm1, %v429_v56 }
 0x272   : > { %v436_v57 = vpop.permute.xlu0 %435 }
 0x273   : > { %573 = vst.msk [vmem:[%s854_s28 + $0x50] sm:$0xff] %vm175_vm1, %v436_v57 }
 0x274   : > { %v438_v58 = vpop.permute.xlu1 %437 }
 0x275   : > { %574 = vst.msk [vmem:[%s854_s28 + $0x58] sm:$0xff] %vm175_vm1, %v438_v58 }
 0x276   : > { %v445_v59 = vpop.permute.xlu0 %444 }
 0x277   : > { %575 = vst.msk [vmem:[%s854_s28 + $0x60] sm:$0xff] %vm175_vm1, %v445_v59 }
 0x278   : > { %v447_v60 = vpop.permute.xlu1 %446 }
 0x279   : > { %576 = vst.msk [vmem:[%s854_s28 + $0x68] sm:$0xff] %vm175_vm1, %v447_v60 }
 0x27a   : > { %v454_v61 = vpop.permute.xlu0 %453 }
 0x27b   : > { %577 = vst.msk [vmem:[%s854_s28 + $0x70] sm:$0xff] %vm175_vm1, %v454_v61 }
 0x27c   : > { %v456_v62 = vpop.permute.xlu1 %455 }
 0x27d   : > { %578 = vst.msk [vmem:[%s854_s28 + $0x78] sm:$0xff] %vm175_vm1, %v456_v62 }
 0x27e   : > { %661 = shalt.err (!%p658_p3)
}
 0x27f   : > { %s662_s20 = scalar_lea.hbm %s897_s9, 2048  ;;  %s666_s26 = scalar_lea.hbm %s951_s3, 4096 }
 0x280   : > { %p663_p4 = scmp.ne.s32.totalorder %s897_s9, %s662_s20  ;;  %p667_p9 = scmp.lt.u32.totalorder %s897_s9, %s951_s3 }
 0x281   : > { %p668_p10 = scmp.lt.u32.totalorder %s666_s26, %s662_s20  ;;  %p670_p12 = scmp.lt.u32.totalorder %s662_s20, %s897_s9 }
 0x282   : > { %p664_p7 = pnand %p663_p4, %p782_p5 }
 0x283   : > { %p669_p11 = por %p668_p10, %p667_p9 }
 0x284   : > { %p665_p8 = pneg %p664_p7 }
 0x285   : > { %p671_p13 = por %p670_p12, %p669_p11 }
 0x287   : > { %p672_p0 = pnand %p671_p13, %p665_p8 }
 0x289   : > { %675 = shalt.err (!%p672_p0)
}
 0x28a   : > { %s722_s5 = smov 128   ;;  %s723_s6 = smov 8  }
 0x28b   : > { %586 = dma.vmem_to_hbm [thread:$0]  (%p782_p5), %s899_s30, 2048, %s897_s9, %s907_s16, %s722_s5, %s722_s5, %s723_s6  }
 0x28c PF: > { %p592_p1 = scmp.ge.s32.totalorder %s710_s15, 2  ;;  %s491_s7 = sand.u32 1, %s698_s12  }
 0x28d   : > { %s492_s29 = scalar_lea.sflag [#allocation5], %s491_s7 }
 0x28e   : > { %p589_p2 = pnand %p592_p1, %p786_p6 }
 0x290   : > { %693 = dma.done.wait (!%p589_p2), %s492_s29, 2048  }
 0x291   : > { %695 = vsyncadd (!%p589_p2), %s492_s29, 4294965248  ;;  %p13_p3 = scmp.ge.s32.totalorder %s769_s18, 4   ;;  %s954_s12 = smov %s702_s13 }
 0x292   : > { %s955_s13 = smov %s706_s14  ;;  %s956_s14 = smov %s780_s21 }
 0x293   : > { %s957_s15 = smov %s769_s18  ;;  %15 = sbr.rel (!%p13_p3) target bundleno = 3 (0x3), region = 77 }
 0x29a   :  { %497 = vsyncpa [#allocation5], 1 }
 0x29b   :  { %499 = vsyncpa [#allocation5 + $0x1], 1 }

</bundles_post_ra>
